<compile_context>
chip_gen: v7x
topology: tpu7x:2x2x1
jax: 0.10.0
libtpu: 0.0.40
codegen_flags: <defaults>
</compile_context>

<pallas_src>
import functools

import numpy as np
import jax
import jax.numpy as jnp
from jax import lax
from jax.experimental import pallas as pl
from jax.experimental.pallas import tpu as pltpu


# ----------------------------------------------------------------------------
# Host-side table precompute (glue) -- (max_length, D) only, never head-tiled.
# ----------------------------------------------------------------------------
def _precompute_cos_sin_alt(dim, end, theta=10000.0):
    """cos, sin_alt of shape (end, dim).

    cos[t, 2i] = cos[t, 2i+1] = cos(t * theta^(-2i/dim))
    sin_alt[t, 2i] = -sin(...), sin_alt[t, 2i+1] = +sin(...)
    (pair-sign folded in so the kernel computes x*cos + swap(x)*sin_alt).
    """
    inv_freq = 1.0 / (theta ** (jnp.arange(0, dim, 2, dtype=jnp.float32) / dim))
    t = jnp.arange(end, dtype=jnp.float32)
    freqs = jnp.outer(t, inv_freq)                         # (end, dim//2)
    cos = jnp.repeat(jnp.cos(freqs), 2, axis=-1)           # (end, dim)
    s = jnp.sin(freqs)
    sin_alt = jnp.stack([-s, s], axis=-1).reshape(end, dim)
    return cos, sin_alt


# ----------------------------------------------------------------------------
# VMEM budgeting (accounts for blocks + scratch + in-kernel temporaries)
# ----------------------------------------------------------------------------
@functools.lru_cache(maxsize=None)
def _vmem_limit_bytes():
    try:
        cap = int(pltpu.get_tpu_info().vmem_capacity_bytes)
    except Exception:
        cap = 64 * 1024 * 1024          # conservative fallback (= v7x per-TC VMEM)
    return min((cap * 3) // 4, 96 * 1024 * 1024)


def _choose_tiling(B, L, HD, D, x_itemsize):
    """Pick (row_tile TL, batch_block NB, vmem_limit)."""
    limit = _vmem_limit_bytes()
    budget = (limit * 2) // 3           # headroom for pipeline bookkeeping / regalloc
    per_row = (4 * HD * x_itemsize      # x + out blocks, double-buffered
               + 4 * D * 4              # cos/sin (TL, D) input blocks, double-buffered
               + 2 * HD * 4             # expanded cos/sin VMEM scratch (single buffer)
               + 4 * HD * 4)            # in-kernel f32 temporaries (cast/rolls/swap/prod)
    rows = max(int(budget // per_row), 8)
    TL = min(rows, 512)                 # >512-row tiles buy <1% of HBM roofline
    if TL >= L:
        TL = L
    else:
        TL = max(8, (TL // 8) * 8)
    NB = 1
    if TL == L and B <= 8 and B * L <= min(rows, 1024):
        NB = B                          # decode-sized: collapse to a single grid step
    return TL, NB, limit


# ----------------------------------------------------------------------------
# Pallas kernel: one (NB, TL, H*D) slab; tables expanded once per sequence tile
# ----------------------------------------------------------------------------
def _rope_kernel(cos_ref, sin_ref, x_ref, o_ref, cos_s, sin_s):
    d = cos_ref.shape[-1]
    nb, _, hd = x_ref.shape
    h = hd // d

    # Expand the (TL, D) tables to (TL, H*D) once per sequence tile.  The batch axis is
    # innermost and sequential ("arbitrary"), so every later batch step reuses the scratch.
    @pl.when(pl.program_id(1) == 0)
    def _():
        c = cos_ref[...]
        s = sin_ref[...]
        for i in range(h):
            cos_s[:, i * d:(i + 1) * d] = c
            sin_s[:, i * d:(i + 1) * d] = s

    cos = cos_s[...]
    sin_alt = sin_s[...]
    lane = lax.broadcasted_iota(jnp.int32, (1, hd), 1)
    is_even = (lane & 1) == 0           # (1, HD); broadcast over sublanes in the select

    for b in range(nb):                 # NB is 1 for prefill, B for decode-sized inputs
        x = x_ref[b].astype(jnp.float32)                # (TL, HD)
        # swap(x): swap[2i] = x[2i+1], swap[2i+1] = x[2i]  (two XLU rolls + parity select;
        # wrap-around lanes are never selected because D is even)
        x_next = pltpu.roll(x, shift=hd - 1, axis=1)    # out[i] = x[i+1]
        x_prev = pltpu.roll(x, shift=1, axis=1)         # out[i] = x[i-1]
        x_swap = jnp.where(is_even, x_next, x_prev)
        o_ref[b] = (x * cos + x_swap * sin_alt).astype(o_ref.dtype)


@jax.jit
def _rope_apply_flat(x3, cos_d, sin_d, start):
    """x3: (B, L, H*D); cos_d/sin_d: (maxL, D) f32; start: traced int32 position offset."""
    B, L, HD = x3.shape
    D = cos_d.shape[-1]
    TL, NB, vmem_limit = _choose_tiling(B, L, HD, D, x3.dtype.itemsize)

    # Tiny (L, D) position slice (traced start => no recompile per decode step).
    cos = lax.dynamic_slice_in_dim(cos_d, start, L, axis=0)
    sin = lax.dynamic_slice_in_dim(sin_d, start, L, axis=0)

    grid = (pl.cdiv(L, TL), B // NB)    # batch innermost: table blocks + scratch reused
    return pl.pallas_call(
        _rope_kernel,
        out_shape=jax.ShapeDtypeStruct((B, L, HD), x3.dtype),
        grid=grid,
        in_specs=[
            pl.BlockSpec((TL, D), lambda j, b: (j, 0)),          # cos  (TL, D)
            pl.BlockSpec((TL, D), lambda j, b: (j, 0)),          # sin_alt (TL, D)
            pl.BlockSpec((NB, TL, HD), lambda j, b: (b, j, 0)),  # x
        ],
        out_specs=pl.BlockSpec((NB, TL, HD), lambda j, b: (b, j, 0)),
        scratch_shapes=[
            pltpu.VMEM((TL, HD), jnp.float32),                   # expanded cos
            pltpu.VMEM((TL, HD), jnp.float32),                   # expanded sin_alt
        ],
        compiler_params=pltpu.CompilerParams(
            dimension_semantics=("parallel", "arbitrary"),
            vmem_limit_bytes=vmem_limit,
        ),
    )(cos, sin, x3)


# ----------------------------------------------------------------------------
# Module-equivalent wrapper (glue)
# ----------------------------------------------------------------------------
class RotaryEmbForCacheQueue:
    def __init__(self, dim_per_attn_head, max_length, theta=10000.0):
        self.dim = dim_per_attn_head
        self.max_length = max_length
        self._cos, self._sin_alt = _precompute_cos_sin_alt(
            dim_per_attn_head, max_length, theta)        # (maxL, D) f32, never head-tiled
        self.q_start = 0
        self.training = False  # inference path exercises the kv-cache offset

    def set_attn_q_start(self, q_start):
        self.q_start = q_start

    def _apply(self, x, start):
        B, L, H, D = x.shape
        x3 = x.reshape(B, L, H * D)                      # free reshape (contiguous merge)
        out = _rope_apply_flat(x3, self._cos, self._sin_alt, start)
        return out.reshape(B, L, H, D)

    def __call__(self, q, k):
        """q: (B, len_q, H, D), k: (B, len_k, H, D)."""
        q_len = q.shape[1]
        maxL = self.max_length

        # k always uses positions [0, k_len)
        k_out = self._apply(k, jnp.int32(0))

        q_start = 0 if self.training else self.q_start
        q_start = jnp.asarray(q_start, dtype=jnp.int32)
        start_q = jnp.minimum(q_start + q_len, maxL) - q_len   # = q_end - q_len
        q_out = self._apply(q, start_q)
        return q_out, k_out


# ----------------------------------------------------------------------------
# Pure-numpy reference for verification
# ----------------------------------------------------------------------------
def _rope_ref(x, positions, dim, theta=10000.0):
    inv_freq = 1.0 / (theta ** (np.arange(0, dim, 2, dtype=np.float32) / dim))
    f = np.outer(positions.astype(np.float32), inv_freq)   # (L, D//2)
    c = np.cos(f)[None, :, None, :]
    s = np.sin(f)[None, :, None, :]
    xe = x[..., 0::2]
    xo = x[..., 1::2]
    oe = xe * c - xo * s
    oo = xe * s + xo * c
    return np.stack([oe, oo], axis=-1).reshape(x.shape)


if __name__ == "__main__":
    B, H, D = 2, 4, 32
    max_length = 32
    len_k, len_q = 16, 8
    q_start = 9  # auto-regressive inference with kv-cache offset

    key = jax.random.PRNGKey(0)
    kq, kk = jax.random.split(key)
    q = jax.random.normal(kq, (B, len_q, H, D), dtype=jnp.float32)
    k = jax.random.normal(kk, (B, len_k, H, D), dtype=jnp.float32)

    rope = RotaryEmbForCacheQueue(D, max_length)
    rope.set_attn_q_start(q_start)

    q_out, k_out = rope(q, k)
    q_out = jax.block_until_ready(q_out)
    k_out = jax.block_until_ready(k_out)

    q_end = min(q_start + len_q, max_length)
    q_ref = _rope_ref(np.asarray(q), np.arange(q_end - len_q, q_end), D)
    k_ref = _rope_ref(np.asarray(k), np.arange(0, len_k), D)
    np.testing.assert_allclose(np.asarray(q_out), q_ref, rtol=1e-5, atol=1e-5)
    np.testing.assert_allclose(np.asarray(k_out), k_ref, rtol=1e-5, atol=1e-5)

    # Change q_start (decode step): same compiled kernel, no retrace on the offset value.
    rope.set_attn_q_start(17)
    q_out2, _ = rope(q, k)
    q_out2 = jax.block_until_ready(q_out2)
    q_end2 = min(17 + len_q, max_length)
    q_ref2 = _rope_ref(np.asarray(q), np.arange(q_end2 - len_q, q_end2), D)
    np.testing.assert_allclose(np.asarray(q_out2), q_ref2, rtol=1e-5, atol=1e-5)

    print("KERNEL_OK")
</pallas_src>

<mosaic_0001>
module attributes {stable_mosaic.version = 11 : i64} {
  func.func @_rope_kernel(%arg0: i32, %arg1: i32, %arg2: memref<16x32xf32, #tpu.memory_space<vmem>>, %arg3: memref<16x32xf32, #tpu.memory_space<vmem>>, %arg4: memref<2x16x128xf32, #tpu.memory_space<vmem>>, %arg5: memref<2x16x128xf32, #tpu.memory_space<vmem>>, %arg6: memref<16x128xf32, #tpu.memory_space<vmem>>, %arg7: memref<16x128xf32, #tpu.memory_space<vmem>>) attributes {dimension_semantics = [#tpu.dimension_semantics<parallel>, #tpu.dimension_semantics<arbitrary>], iteration_bounds = array<i64: 1, 1>, scalar_prefetch = 0 : i64, scratch_operands = 2 : i64, tpu.core_type = #tpu.core_type<tc>, window_params = [{transform_indices = @transform_0, window_bounds = array<i64: 16, 32>}, {transform_indices = @transform_1, window_bounds = array<i64: 16, 32>}, {transform_indices = @transform_2, window_bounds = array<i64: 2, 16, 128>}, {transform_indices = @transform_3, window_bounds = array<i64: 2, 16, 128>}]} {
    %c0_i32 = arith.constant 0 : i32
    %0 = arith.cmpi eq, %arg1, %c0_i32 : i32
    %1 = arith.extui %0 : i1 to i32
    %c0_i32_0 = arith.constant 0 : i32
    %2 = arith.cmpi ne, %1, %c0_i32_0 : i32
    scf.if %2 {
      %c0_19 = arith.constant 0 : index
      %c0_20 = arith.constant 0 : index
      %36 = vector.load %arg2[%c0_19, %c0_20] : memref<16x32xf32, #tpu.memory_space<vmem>>, vector<16x32xf32>
      %c0_21 = arith.constant 0 : index
      %c0_22 = arith.constant 0 : index
      %37 = vector.load %arg3[%c0_21, %c0_22] : memref<16x32xf32, #tpu.memory_space<vmem>>, vector<16x32xf32>
      %c0_23 = arith.constant 0 : index
      %c0_24 = arith.constant 0 : index
      %38 = vector.load %arg6[%c0_23, %c0_24] : memref<16x128xf32, #tpu.memory_space<vmem>>, vector<16x32xf32>
      tpu.vector_store %arg6[%c0_23, %c0_24], %36 {strides = array<i32>} : memref<16x128xf32, #tpu.memory_space<vmem>>, vector<16x32xf32>,
      %c0_25 = arith.constant 0 : index
      %c0_26 = arith.constant 0 : index
      %39 = vector.load %arg7[%c0_25, %c0_26] : memref<16x128xf32, #tpu.memory_space<vmem>>, vector<16x32xf32>
      tpu.vector_store %arg7[%c0_25, %c0_26], %37 {strides = array<i32>} : memref<16x128xf32, #tpu.memory_space<vmem>>, vector<16x32xf32>,
      %c0_27 = arith.constant 0 : index
      %c32 = arith.constant 32 : index
      %40 = vector.load %arg6[%c0_27, %c32] : memref<16x128xf32, #tpu.memory_space<vmem>>, vector<16x32xf32>
      tpu.vector_store %arg6[%c0_27, %c32], %36 {strides = array<i32>} : memref<16x128xf32, #tpu.memory_space<vmem>>, vector<16x32xf32>,
      %c0_28 = arith.constant 0 : index
      %c32_29 = arith.constant 32 : index
      %41 = vector.load %arg7[%c0_28, %c32_29] : memref<16x128xf32, #tpu.memory_space<vmem>>, vector<16x32xf32>
      tpu.vector_store %arg7[%c0_28, %c32_29], %37 {strides = array<i32>} : memref<16x128xf32, #tpu.memory_space<vmem>>, vector<16x32xf32>,
      %c0_30 = arith.constant 0 : index
      %c64 = arith.constant 64 : index
      %42 = vector.load %arg6[%c0_30, %c64] : memref<16x128xf32, #tpu.memory_space<vmem>>, vector<16x32xf32>
      tpu.vector_store %arg6[%c0_30, %c64], %36 {strides = array<i32>} : memref<16x128xf32, #tpu.memory_space<vmem>>, vector<16x32xf32>,
      %c0_31 = arith.constant 0 : index
      %c64_32 = arith.constant 64 : index
      %43 = vector.load %arg7[%c0_31, %c64_32] : memref<16x128xf32, #tpu.memory_space<vmem>>, vector<16x32xf32>
      tpu.vector_store %arg7[%c0_31, %c64_32], %37 {strides = array<i32>} : memref<16x128xf32, #tpu.memory_space<vmem>>, vector<16x32xf32>,
      %c0_33 = arith.constant 0 : index
      %c96 = arith.constant 96 : index
      %44 = vector.load %arg6[%c0_33, %c96] : memref<16x128xf32, #tpu.memory_space<vmem>>, vector<16x32xf32>
      tpu.vector_store %arg6[%c0_33, %c96], %36 {strides = array<i32>} : memref<16x128xf32, #tpu.memory_space<vmem>>, vector<16x32xf32>,
      %c0_34 = arith.constant 0 : index
      %c96_35 = arith.constant 96 : index
      %45 = vector.load %arg7[%c0_34, %c96_35] : memref<16x128xf32, #tpu.memory_space<vmem>>, vector<16x32xf32>
      tpu.vector_store %arg7[%c0_34, %c96_35], %37 {strides = array<i32>} : memref<16x128xf32, #tpu.memory_space<vmem>>, vector<16x32xf32>,
    } else {
    }
    %c0 = arith.constant 0 : index
    %c0_1 = arith.constant 0 : index
    %3 = vector.load %arg6[%c0, %c0_1] : memref<16x128xf32, #tpu.memory_space<vmem>>, vector<16x128xf32>
    %c0_2 = arith.constant 0 : index
    %c0_3 = arith.constant 0 : index
    %4 = vector.load %arg7[%c0_2, %c0_3] : memref<16x128xf32, #tpu.memory_space<vmem>>, vector<16x128xf32>
    %5 = tpu.iota {dimensions = array<i32: 1>} : vector<1x128xi32>
    %c1_i32 = arith.constant 1 : i32
    %6 = vector.broadcast %c1_i32 : i32 to vector<1x128xi32>
    %7 = arith.andi %5, %6 : vector<1x128xi32>
    %c0_i32_4 = arith.constant 0 : i32
    %8 = vector.broadcast %c0_i32_4 : i32 to vector<1x128xi32>
    %9 = arith.cmpi eq, %7, %8 : vector<1x128xi32>
    %c0_5 = arith.constant 0 : index
    %c0_6 = arith.constant 0 : index
    %c0_7 = arith.constant 0 : index
    %10 = vector.load %arg4[%c0_5, %c0_6, %c0_7] : memref<2x16x128xf32, #tpu.memory_space<vmem>>, vector<1x16x128xf32>
    %11 = vector.shape_cast %10 : vector<1x16x128xf32> to vector<16x128xf32>
    %c127_i32 = arith.constant 127 : i32
    %12 = tpu.dynamic_rotate %11 by %c127_i32 dim 1 : vector<16x128xf32>, i32 -> vector<16x128xf32>
    %c1_i32_8 = arith.constant 1 : i32
    %13 = tpu.dynamic_rotate %11 by %c1_i32_8 dim 1 : vector<16x128xf32>, i32 -> vector<16x128xf32>
    %14 = vector.shape_cast %9 : vector<1x128xi1> to vector<1x128xi1>
    %15 = vector.broadcast %14 : vector<1x128xi1> to vector<16x128xi1>
    %16 = arith.select %15, %12, %13 : vector<16x128xi1>, vector<16x128xf32>
    %17 = arith.mulf %11, %3 : vector<16x128xf32>
    %18 = arith.mulf %16, %4 : vector<16x128xf32>
    %19 = arith.addf %17, %18 : vector<16x128xf32>
    %c0_9 = arith.constant 0 : index
    %c0_10 = arith.constant 0 : index
    %c0_11 = arith.constant 0 : index
    %20 = vector.load %arg5[%c0_9, %c0_10, %c0_11] : memref<2x16x128xf32, #tpu.memory_space<vmem>>, vector<1x16x128xf32>
    %21 = vector.shape_cast %20 : vector<1x16x128xf32> to vector<16x128xf32>
    %22 = vector.shape_cast %19 : vector<16x128xf32> to vector<1x16x128xf32>
    tpu.vector_store %arg5[%c0_9, %c0_10, %c0_11], %22 {strides = array<i32>} : memref<2x16x128xf32, #tpu.memory_space<vmem>>, vector<1x16x128xf32>,
    %c1 = arith.constant 1 : index
    %c0_12 = arith.constant 0 : index
    %c0_13 = arith.constant 0 : index
    %23 = vector.load %arg4[%c1, %c0_12, %c0_13] : memref<2x16x128xf32, #tpu.memory_space<vmem>>, vector<1x16x128xf32>
    %24 = vector.shape_cast %23 : vector<1x16x128xf32> to vector<16x128xf32>
    %c127_i32_14 = arith.constant 127 : i32
    %25 = tpu.dynamic_rotate %24 by %c127_i32_14 dim 1 : vector<16x128xf32>, i32 -> vector<16x128xf32>
    %c1_i32_15 = arith.constant 1 : i32
    %26 = tpu.dynamic_rotate %24 by %c1_i32_15 dim 1 : vector<16x128xf32>, i32 -> vector<16x128xf32>
    %27 = vector.shape_cast %9 : vector<1x128xi1> to vector<1x128xi1>
    %28 = vector.broadcast %27 : vector<1x128xi1> to vector<16x128xi1>
    %29 = arith.select %28, %25, %26 : vector<16x128xi1>, vector<16x128xf32>
    %30 = arith.mulf %24, %3 : vector<16x128xf32>
    %31 = arith.mulf %29, %4 : vector<16x128xf32>
    %32 = arith.addf %30, %31 : vector<16x128xf32>
    %c1_16 = arith.constant 1 : index
    %c0_17 = arith.constant 0 : index
    %c0_18 = arith.constant 0 : index
    %33 = vector.load %arg5[%c1_16, %c0_17, %c0_18] : memref<2x16x128xf32, #tpu.memory_space<vmem>>, vector<1x16x128xf32>
    %34 = vector.shape_cast %33 : vector<1x16x128xf32> to vector<16x128xf32>
    %35 = vector.shape_cast %32 : vector<16x128xf32> to vector<1x16x128xf32>
    tpu.vector_store %arg5[%c1_16, %c0_17, %c0_18], %35 {strides = array<i32>} : memref<2x16x128xf32, #tpu.memory_space<vmem>>, vector<1x16x128xf32>,
    return
  }
  func.func @transform_0(%arg0: i32, %arg1: i32) -> (i32, i32) {
    %c0_i32 = arith.constant 0 : i32
    %c0_i32_0 = arith.constant 0 : i32
    return %arg0, %c0_i32 : i32, i32
  }
  func.func @transform_1(%arg0: i32, %arg1: i32) -> (i32, i32) {
    %c0_i32 = arith.constant 0 : i32
    %c0_i32_0 = arith.constant 0 : i32
    return %arg0, %c0_i32 : i32, i32
  }
  func.func @transform_2(%arg0: i32, %arg1: i32) -> (i32, i32, i32) {
    %c0_i32 = arith.constant 0 : i32
    %c0_i32_0 = arith.constant 0 : i32
    return %arg1, %arg0, %c0_i32 : i32, i32, i32
  }
  func.func @transform_3(%arg0: i32, %arg1: i32) -> (i32, i32, i32) {
    %c0_i32 = arith.constant 0 : i32
    %c0_i32_0 = arith.constant 0 : i32
    return %arg1, %arg0, %c0_i32 : i32, i32, i32
  }
}

</mosaic_0001>

<bundles_post_ra>
// kernel: _rope_apply_flat.1
= control target key start
LH: loop header
LB: loop body
LE: loop exit
PB: predicated region body
PF: predicated region fallthrough
CT: control target
= control target key end

     0   :  { %vm23_vm0 = vcmask 261120   ;;  %s185_s18 = smov 32   ;;  %s271_s0 = inlined_call_operand.vmem [shape: f32[16,32], index: 0, kind: input, shape index: {}]   ;;  %s272_s1 = inlined_call_operand.vmem [shape: f32[16,32], index: 1, kind: input, shape index: {}]   ;;  %s273_s2 = inlined_call_operand.vmem [shape: f32[2,16,128], index: 2, kind: input, shape index: {}]   ;;  %s274_s3 = inlined_call_operand.hbm [shape: f32[2,16,128], index: 3, kind: output, shape index: {}]  }
   0x1   :  { %v21_v0 = vld [vmem:[%s272_s1] sm:$0xff]  ;;  %v22_v2 = vld [vmem:[%s272_s1 + $0x8] sm:$0xff] }
   0x2   :  { %v19_v1 = vld [vmem:[%s271_s0] sm:$0xff]  ;;  %41 = vrot.lane.b32.xlu1 %v21_v0, %s185_s18  ;;  %v20_v3 = vld [vmem:[%s271_s0 + $0x8] sm:$0xff]  ;;  %26 = vst.msk [vmem:[#allocation3] sm:$0xff] %vm23_vm0, %v21_v0  ;;  %27 = vst.msk [vmem:[#allocation3 + $0x8] sm:$0xff] %vm23_vm0, %v22_v2 }
   0x3   :  { %30 = vrot.lane.b32.xlu0 %v19_v1, %s185_s18  ;;  %24 = vst.msk [vmem:[#allocation2] sm:$0xff] %vm23_vm0, %v19_v1  ;;  %25 = vst.msk [vmem:[#allocation2 + $0x8] sm:$0xff] %vm23_vm0, %v20_v3 }
   0x4   :  { %8 = vsyncpa [#allocation5], 0  ;;  %s186_s21 = smov 64   ;;  %s187_s1 = smov 96   ;;  %v92_v4 = vld [vmem:[%s273_s2 + $0x8] sm:$0xff]  ;;  %v91_v5 = vld [vmem:[%s273_s2] sm:$0xff]  ;;  %v87_v16 = vlaneseq }
   0x5   :  { %s188_s25 = smov 127   ;;  %s189_s26 = smov 1   ;;  %v234_v6 = vld [vmem:[%s273_s2 + $0x18] sm:$0xff]  ;;  %v239_v7 = vld [vmem:[%s273_s2 + $0x10] sm:$0xff]  ;;  %vm36_vm1 = vcmask 523520   ;;  %vm55_vm2 = vcmask 785920  }
   0x6   :  { %43 = vrot.lane.b32.xlu1 %v22_v2, %s185_s18  ;;  %vm72_vm3 = vcmask 1048320   ;;  %v88_v19 = vand.u32 127, %v87_v16  ;;  %s190_s2 = smov [#allocation4]  }
   0x7   :  { %32 = vrot.lane.b32.xlu0 %v20_v3, %s185_s18  ;;  %s140_s4 = sshll.u32 %s190_s2, 4  ;;  %s141_s4 = int_to_ptr.vmem [resolvable:$true] %s140_s4 }
   0x8   :  { %v89_v22 = vand.u32 1, %v88_v19  ;;  %s161_s5 = scalar_lea.vmem %s141_s4, 512  ;;  %p166_p1 = scmp.lt.s32.totalorder %s141_s4, %s141_s4 }
   0x9   :  { %p162_p0 = scmp.ne.s32.totalorder %s141_s4, %s161_s5  ;;  %p167_p2 = scmp.lt.s32.totalorder %s161_s5, %s161_s5 }
   0xa   :  { %51 = vrot.lane.b32.xlu1 %v20_v3, %s186_s21  ;;  %vm245_vm4 = vcmp.eq.s32.totalorder %v89_v22, 0 }
   0xb   :  { %49 = vrot.lane.b32.xlu0 %v19_v1, %s186_s21  ;;  %p168_p3 = por %p167_p2, %p166_p1 }
   0xd   :  { %p169_p4 = pnand %p168_p3, %p162_p0 }
   0xe   :  { %60 = vrot.lane.b32.xlu1 %v22_v2, %s186_s21 }
   0xf   :  { %58 = vrot.lane.b32.xlu0 %v21_v0, %s186_s21 }
  0x12   :  { %68 = vrot.lane.b32.xlu1 %v20_v3, %s187_s1 }
  0x13   :  { %66 = vrot.lane.b32.xlu0 %v19_v1, %s187_s1 }
  0x16   :  { %77 = vrot.lane.b32.xlu1 %v22_v2, %s187_s1 }
  0x17   :  { %75 = vrot.lane.b32.xlu0 %v21_v0, %s187_s1 }
  0x1a   :  { %95 = vrot.lane.b32.xlu1 %v92_v4, %s188_s25 }
  0x1b   :  { %93 = vrot.lane.b32.xlu0 %v91_v5, %s188_s25 }
  0x1e   :  { %99 = vrot.lane.b32.xlu1 %v92_v4, %s189_s26 }
  0x1f   :  { %97 = vrot.lane.b32.xlu0 %v91_v5, %s189_s26 }
  0x22   :  { %118 = vrot.lane.b32.xlu1 %v234_v6, %s188_s25 }
  0x23   :  { %116 = vrot.lane.b32.xlu0 %v239_v7, %s188_s25 }
  0x26   :  { %122 = vrot.lane.b32.xlu1 %v234_v6, %s189_s26 }
  0x27   :  { %120 = vrot.lane.b32.xlu0 %v239_v7, %s189_s26 }
  0x74   :  { %v42_v8 = vpop.permute.xlu1 %41 }
  0x75   :  { %v31_v9 = vpop.permute.xlu0 %30  ;;  %47 = vst.msk [vmem:[#allocation3] sm:$0xff] %vm36_vm1, %v42_v8 }
  0x76   :  { %37 = vst.msk [vmem:[#allocation2] sm:$0xff] %vm36_vm1, %v31_v9 }
  0x78   :  { %v44_v10 = vpop.permute.xlu1 %43 }
  0x79   :  { %v33_v11 = vpop.permute.xlu0 %32  ;;  %48 = vst.msk [vmem:[#allocation3 + $0x8] sm:$0xff] %vm36_vm1, %v44_v10 }
  0x7a   :  { %38 = vst.msk [vmem:[#allocation2 + $0x8] sm:$0xff] %vm36_vm1, %v33_v11 }
  0x7c   :  { %v52_v12 = vpop.permute.xlu1 %51 }
  0x7d   :  { %v50_v13 = vpop.permute.xlu0 %49  ;;  %57 = vst.msk [vmem:[#allocation2 + $0x8] sm:$0xff] %vm55_vm2, %v52_v12 }
  0x7e   :  { %56 = vst.msk [vmem:[#allocation2] sm:$0xff] %vm55_vm2, %v50_v13 }
  0x80   :  { %v61_v14 = vpop.permute.xlu1 %60 }
  0x81   :  { %v59_v15 = vpop.permute.xlu0 %58  ;;  %65 = vst.msk [vmem:[#allocation3 + $0x8] sm:$0xff] %vm55_vm2, %v61_v14 }
  0x82   :  { %64 = vst.msk [vmem:[#allocation3] sm:$0xff] %vm55_vm2, %v59_v15 }
  0x84   :  { %v69_v17 = vpop.permute.xlu1 %68 }
  0x85   :  { %v67_v18 = vpop.permute.xlu0 %66  ;;  %74 = vst.msk [vmem:[#allocation2 + $0x8] sm:$0xff] %vm72_vm3, %v69_v17 }
  0x86   :  { %73 = vst.msk [vmem:[#allocation2] sm:$0xff] %vm72_vm3, %v67_v18 }
  0x88   :  { %v78_v20 = vpop.permute.xlu1 %77 }
  0x89   :  { %v76_v21 = vpop.permute.xlu0 %75  ;;  %82 = vst.msk [vmem:[#allocation3 + $0x8] sm:$0xff] %vm72_vm3, %v78_v20 }
  0x8a   :  { %81 = vst.msk [vmem:[#allocation3] sm:$0xff] %vm72_vm3, %v76_v21 }
  0x8c   :  { %v96_v23 = vpop.permute.xlu1 %95  ;;  %v84_v26 = vld [vmem:[#allocation2 + $0x8] sm:$0xff] }
  0x8d   :  { %v94_v24 = vpop.permute.xlu0 %93  ;;  %v83_v27 = vld [vmem:[#allocation2] sm:$0xff]  ;;  %v106_v34 = vmul.f32 %v92_v4, %v84_v26  ;;  %v127_v46 = vmul.f32 %v234_v6, %v84_v26 }
  0x8e   :  { %v105_v36 = vmul.f32 %v91_v5, %v83_v27  ;;  %v126_v48 = vmul.f32 %v239_v7, %v83_v27 }
  0x90   :  { %v86_v28 = vld [vmem:[#allocation3 + $0x8] sm:$0xff]  ;;  %v100_v29 = vpop.permute.xlu1 %99 }
  0x91   :  { %v85_v30 = vld [vmem:[#allocation3] sm:$0xff]  ;;  %v98_v31 = vpop.permute.xlu0 %97  ;;  %v104_v32 = vsel %vm245_vm4, %v96_v23, %v100_v29 }
  0x92   :  { %v103_v33 = vsel %vm245_vm4, %v94_v24, %v98_v31  ;;  %v108_v35 = vmul.f32 %v104_v32, %v86_v28 }
  0x93   :  { %v107_v37 = vmul.f32 %v103_v33, %v85_v30 }
  0x94   :  { %v110_v38 = vadd.f32 %v108_v35, %v106_v34  ;;  %v119_v40 = vpop.permute.xlu1 %118 }
  0x95   :  { %v109_v39 = vadd.f32 %v107_v37, %v105_v36  ;;  %v117_v41 = vpop.permute.xlu0 %116 }
  0x96   :  { %112 = vst [vmem:[#allocation4 + $0x8] sm:$0xff] %v110_v38 }
  0x97   :  { %111 = vst [vmem:[#allocation4] sm:$0xff] %v109_v39 }
  0x98   :  { %v123_v42 = vpop.permute.xlu1 %122 }
  0x99   :  { %v121_v43 = vpop.permute.xlu0 %120  ;;  %v125_v44 = vsel %vm245_vm4, %v119_v40, %v123_v42 }
  0x9a   :  { %v124_v45 = vsel %vm245_vm4, %v117_v41, %v121_v43  ;;  %v129_v47 = vmul.f32 %v125_v44, %v86_v28 }
  0x9b   :  { %v128_v49 = vmul.f32 %v124_v45, %v85_v30 }
  0x9c   :  { %v131_v50 = vadd.f32 %v129_v47, %v127_v46 }
  0x9d   :  { %v130_v51 = vadd.f32 %v128_v49, %v126_v48 }
  0x9e   :  { %134 = vst [vmem:[#allocation4 + $0x18] sm:$0xff] %v131_v50 }
  0x9f   :  { %133 = vst [vmem:[#allocation4 + $0x10] sm:$0xff] %v130_v51 }
  0xa0   :  { %172 = shalt.err (!%p169_p4)
}
  0xa1   :  { %s173_s8 = scalar_lea.hbm %s274_s3, 512 }
  0xa2   :  { %p174_p5 = scmp.ne.s32.totalorder %s274_s3, %s173_s8  ;;  %p177_p6 = scmp.lt.u32.totalorder %s173_s8, %s274_s3 }
  0xa4   :  { %p179_p7 = pnand %p177_p6, %p174_p5 }
  0xa6   :  { %182 = shalt.err (!%p179_p7)
}
  0xa7   :  { %s191_s13 = smov 128   ;;  %s192_s14 = smov 8  }
  0xa8   :  { %146 = dma.vmem_to_hbm [thread:$0]  %s141_s4, 512, %s274_s3, [#allocation5], %s191_s13, %s191_s13, %s192_s14  }
  0xa9   :  { %183 = dma.done.wait [#allocation5], 512  }
  0xaa   :  { %184 = vsyncadd [#allocation5], 4294966784 }
  0xab   :  { %150 = vsyncpa [#allocation5], 1 }

</bundles_post_ra>
